<compile_context>
chip_gen: v7x
topology: tpu7x:2x2x1
jax: 0.10.0
libtpu: 0.0.40
codegen_flags: <defaults>
</compile_context>

<pallas_src>
import functools

import jax
import jax.numpy as jnp
from jax.experimental import pallas as pl
from jax.experimental.pallas import tpu as pltpu


def _round_up(x, m):
    return ((x + m - 1) // m) * m


def _cdiv(a, b):
    return (a + b - 1) // b


_LANE = 128
_INT8_SUBLANE = 32  # int8 min tile is (32, 128)


def _item_kernel(x_ref, ws_ref, out_ref, *, np_out):
    # x: (TB, Kp) int8 0/1 -> cast on the VPU (non-binding slot).
    x = x_ref[...].astype(jnp.float32)
    # ONE fused MXU pass over [weights | group-indicators] packed along lanes.
    r = jnp.dot(x, ws_ref[...], preferred_element_type=jnp.float32)  # (TB, 2*Np)
    # Both halves are 128-lane aligned slices -> no relayout; one exact divide.
    out_ref[...] = r[:, :np_out] / r[:, np_out:]


def prepare_item_params(rate_table, genre_w_t, dir_w_t, act_w_t):
    """Build the fused (Kp, 2*Np) RHS once per parameter set (hoisted out of forward).

    rate_table: (num_rate, D); *_w_t: (F, D) [torch Linear weight transposed]."""
    num_rate, D = rate_table.shape
    num_genre = genre_w_t.shape[0]
    num_director = dir_w_t.shape[0]
    num_actor = act_w_t.shape[0]

    K = num_rate + num_genre + num_director + num_actor
    Kp = _round_up(K, _LANE)
    N = 4 * D
    Np = _round_up(N, _LANE)

    f32 = jnp.float32
    o_r = 0
    o_g = num_rate
    o_d = num_rate + num_genre
    o_a = num_rate + num_genre + num_director

    ws = jnp.zeros((Kp, 2 * Np), f32)
    # Left half: block-diagonal fused weight.
    ws = ws.at[o_r:o_r + num_rate,     0 * D:1 * D].set(rate_table.astype(f32))
    ws = ws.at[o_g:o_g + num_genre,    1 * D:2 * D].set(genre_w_t.astype(f32))
    ws = ws.at[o_d:o_d + num_director, 2 * D:3 * D].set(dir_w_t.astype(f32))
    ws = ws.at[o_a:o_a + num_actor,    3 * D:4 * D].set(act_w_t.astype(f32))
    # Right half: 0/1 group indicators -> per-branch row-sum denominators.
    # Rate columns use the one-hot rows -> denominator exactly 1.0.
    ws = ws.at[o_r:o_r + num_rate,     Np + 0 * D:Np + 1 * D].set(1.0)
    ws = ws.at[o_g:o_g + num_genre,    Np + 1 * D:Np + 2 * D].set(1.0)
    ws = ws.at[o_d:o_d + num_director, Np + 2 * D:Np + 3 * D].set(1.0)
    ws = ws.at[o_a:o_a + num_actor,    Np + 3 * D:Np + 4 * D].set(1.0)
    if Np > N:  # padded output columns of valid rows: keep denominator 1 (no 0/0)
        ws = ws.at[o_r:o_r + num_rate, Np + N:].set(1.0)

    meta = dict(num_rate=num_rate, num_genre=num_genre, num_director=num_director,
                num_actor=num_actor, D=D, K=K, Kp=Kp, N=N, Np=Np)
    return ws, meta


def item_forward(ws, meta, rate_idx, genre_idx, director_idx, actors_idx,
                 *, batch_tile=1024):
    """rate_idx: (B,) int32; *_idx: (B, F) int32 multi-hot; ws/meta from prepare_item_params."""
    B = rate_idx.shape[0]
    Kp, K, N, Np = meta["Kp"], meta["K"], meta["N"], meta["Np"]
    num_rate = meta["num_rate"]

    # ---- batch tile: multiple of 32 (int8 sublane tile), >= 2 grid steps when the
    #      batch allows it (v7x: both TensorCores get work), padding waste < TB rows.
    mult = _INT8_SUBLANE
    TB = _round_up(min(max(batch_tile, 1), max(B, 1)), mult)
    Bp_min = _round_up(B, mult)
    if Bp_min >= 2 * mult:
        TB = min(TB, _round_up(_cdiv(Bp_min, 2), mult))
    Bp = _round_up(B, TB)

    i8 = jnp.int8
    # ---- fused lane-dense int8 input: [one_hot(rate) | genre | director | actors] ----
    rate_oh = jax.nn.one_hot(rate_idx, num_rate, dtype=i8)           # (B, num_rate)
    x = jnp.concatenate([rate_oh,
                         genre_idx.astype(i8),
                         director_idx.astype(i8),
                         actors_idx.astype(i8)], axis=1)             # (B, K)
    # Padded batch rows are all-zero -> their (discarded) output rows are NaN.
    x = jnp.pad(x, ((0, Bp - B), (0, Kp - K)))

    kernel = functools.partial(_item_kernel, np_out=Np)
    out = pl.pallas_call(
        kernel,
        out_shape=jax.ShapeDtypeStruct((Bp, Np), jnp.float32),
        grid=(Bp // TB,),
        in_specs=[
            pl.BlockSpec((TB, Kp), lambda i: (i, 0)),        # batch-tiled int8 input
            pl.BlockSpec((Kp, 2 * Np), lambda i: (0, 0)),    # fused [w | s], VMEM-resident
        ],
        out_specs=pl.BlockSpec((TB, Np), lambda i: (i, 0)),  # lane-dense output
        compiler_params=pltpu.CompilerParams(
            dimension_semantics=("parallel",)),               # shards tiles across v7x TCs
    )(x, ws)

    return out[:B, :N]


if __name__ == "__main__":
    # config (small, synthetic)
    num_rate, num_genre, num_director, num_actor = 6, 25, 32, 64
    embedding_dim = 32
    B = 8

    key = jax.random.PRNGKey(0)
    k1, k2, k3, k4, k5, k6, k7, k8 = jax.random.split(key, 8)

    # deterministic parameter init (synthetic, not a checkpoint)
    rate_table = jax.random.normal(k1, (num_rate, embedding_dim), jnp.float32) * 0.1
    genre_w_t = jax.random.normal(k2, (num_genre, embedding_dim), jnp.float32) * 0.1
    dir_w_t = jax.random.normal(k3, (num_director, embedding_dim), jnp.float32) * 0.1
    act_w_t = jax.random.normal(k4, (num_actor, embedding_dim), jnp.float32) * 0.1

    # inputs
    rate_idx = jax.random.randint(k5, (B,), 0, num_rate, jnp.int32)

    def multi_hot(k, n):
        m = (jax.random.uniform(k, (B, n)) < 0.3).astype(jnp.int32)
        return m.at[:, 0].set(1)  # ensure at least one active entry per row

    genre_idx = multi_hot(k6, num_genre)
    director_idx = multi_hot(k7, num_director)
    actors_idx = multi_hot(k8, num_actor)

    # fused RHS built ONCE per parameter set (hoisted out of the forward pass)
    ws, meta = prepare_item_params(rate_table, genre_w_t, dir_w_t, act_w_t)
    ws = jax.block_until_ready(ws)

    out = item_forward(ws, meta, rate_idx, genre_idx, director_idx, actors_idx)
    out = jax.block_until_ready(out)

    # pure-JAX reference check
    rate_ref = rate_table[rate_idx]
    gf = genre_idx.astype(jnp.float32)
    df = director_idx.astype(jnp.float32)
    af = actors_idx.astype(jnp.float32)
    ref = jnp.concatenate([
        rate_ref,
        (gf @ genre_w_t) / gf.sum(1, keepdims=True),
        (df @ dir_w_t) / df.sum(1, keepdims=True),
        (af @ act_w_t) / af.sum(1, keepdims=True),
    ], axis=1)

    assert out.shape == (B, 4 * embedding_dim)
    assert jnp.allclose(out, ref, atol=1e-5, rtol=1e-5)
    print("KERNEL_OK")
</pallas_src>

<mosaic_0001>
module attributes {stable_mosaic.version = 11 : i64} {
  func.func @_item_kernel(%arg0: i32, %arg1: memref<32x128xi8, #tpu.memory_space<vmem>>, %arg2: memref<128x256xf32, #tpu.memory_space<vmem>>, %arg3: memref<32x128xf32, #tpu.memory_space<vmem>>) attributes {dimension_semantics = [#tpu.dimension_semantics<parallel>], iteration_bounds = array<i64: 1>, scalar_prefetch = 0 : i64, scratch_operands = 0 : i64, tpu.core_type = #tpu.core_type<tc>, window_params = [{transform_indices = @transform_0, window_bounds = array<i64: 32, 128>}, {pipeline_mode = #tpu.pipeline_mode<synchronous>, transform_indices = @transform_1, window_bounds = array<i64: 128, 256>}, {transform_indices = @transform_2, window_bounds = array<i64: 32, 128>}]} {
    %c0 = arith.constant 0 : index
    %c0_0 = arith.constant 0 : index
    %0 = vector.load %arg1[%c0, %c0_0] : memref<32x128xi8, #tpu.memory_space<vmem>>, vector<32x128xi8>
    %1 = arith.sitofp %0 : vector<32x128xi8> to vector<32x128xf32>
    %c0_1 = arith.constant 0 : index
    %c0_2 = arith.constant 0 : index
    %2 = vector.load %arg2[%c0_1, %c0_2] : memref<128x256xf32, #tpu.memory_space<vmem>>, vector<128x256xf32>
    %cst = arith.constant dense<0.000000e+00> : vector<32x256xf32>
    %3 = tpu.matmul %1, %2, %cst {dimension_numbers = #tpu.dot_dimension_numbers<[1], [0], [0], [1], [0, 0, 1, 1], [], []>} : vector<32x128xf32>, vector<128x256xf32>, vector<32x256xf32> -> vector<32x256xf32>
    %4 = vector.extract_strided_slice %3 {offsets = [0, 0], sizes = [32, 128], strides = [1, 1]} : vector<32x256xf32> to vector<32x128xf32>
    %5 = vector.extract_strided_slice %3 {offsets = [0, 128], sizes = [32, 128], strides = [1, 1]} : vector<32x256xf32> to vector<32x128xf32>
    %6 = arith.divf %4, %5 : vector<32x128xf32>
    %c0_3 = arith.constant 0 : index
    %c0_4 = arith.constant 0 : index
    %7 = vector.load %arg3[%c0_3, %c0_4] : memref<32x128xf32, #tpu.memory_space<vmem>>, vector<32x128xf32>
    tpu.vector_store %arg3[%c0_3, %c0_4], %6 {strides = array<i32>} : memref<32x128xf32, #tpu.memory_space<vmem>>, vector<32x128xf32>,
    return
  }
  func.func @transform_0(%arg0: i32) -> (i32, i32) {
    %c0_i32 = arith.constant 0 : i32
    %c0_i32_0 = arith.constant 0 : i32
    return %arg0, %c0_i32 : i32, i32
  }
  func.func @transform_1(%arg0: i32) -> (i32, i32) {
    %c0_i32 = arith.constant 0 : i32
    %c0_i32_0 = arith.constant 0 : i32
    %c0_i32_1 = arith.constant 0 : i32
    return %c0_i32, %c0_i32_0 : i32, i32
  }
  func.func @transform_2(%arg0: i32) -> (i32, i32) {
    %c0_i32 = arith.constant 0 : i32
    %c0_i32_0 = arith.constant 0 : i32
    return %arg0, %c0_i32 : i32, i32
  }
}

</mosaic_0001>

<bundles_post_ra>
// kernel: tpu_custom_call.1
= control target key start
LH: loop header
LB: loop body
LE: loop exit
PB: predicated region body
PF: predicated region fallthrough
CT: control target
= control target key end

     0   :  { %7 = vsyncpa [#allocation3], 0  ;;  %s404_s0 = inlined_call_operand.hbm [shape: s8[32,128], index: 0, kind: input, shape index: {}]   ;;  %s405_s1 = inlined_call_operand.hbm [shape: f32[128,256], index: 1, kind: input, shape index: {}]   ;;  %s406_s2 = inlined_call_operand.hbm [shape: f32[32,128], index: 2, kind: output, shape index: {}]  }
   0x1   :  { %8 = vsyncpa [#allocation6], 0 }
   0x2   :  { %9 = vsyncpa [#allocation4], 0  ;;  %s334_s9 = smov [#allocation2]   ;;  %s335_s11 = smov [#allocation5]  }
   0x3   :  { %s16_s10 = sshll.u32 %s334_s9, 4  ;;  %s25_s12 = sshll.u32 %s335_s11, 4  ;;  %s17_s10 = int_to_ptr.vmem [resolvable:$true] %s16_s10  ;;  %s357_s12 = int_to_ptr.vmem [resolvable:$true] %s25_s12 }
   0x4   :  { %s262_s15 = scalar_lea.hbm %s404_s0, 128 }
   0x5   :  { %p263_p0 = scmp.ne.s32.totalorder %s404_s0, %s262_s15  ;;  %p266_p1 = scmp.lt.u32.totalorder %s262_s15, %s404_s0 }
   0x7   :  { %p268_p2 = pnand %p266_p1, %p263_p0 }
   0x9   :  { %271 = shalt.err (!%p268_p2)
}
   0xa   :  { %s272_s20 = scalar_lea.vmem %s17_s10, 128  ;;  %p277_p4 = scmp.lt.s32.totalorder %s17_s10, %s17_s10 }
   0xb   :  { %p273_p3 = scmp.ne.s32.totalorder %s17_s10, %s272_s20  ;;  %p278_p5 = scmp.lt.s32.totalorder %s272_s20, %s272_s20 }
   0xd   :  { %p279_p6 = por %p278_p5, %p277_p4 }
   0xf   :  { %p280_p7 = pnand %p279_p6, %p273_p3 }
  0x11   :  { %283 = shalt.err (!%p280_p7)
}
  0x12   :  { %19 = dma.hbm_to_vmem [thread:$0]  %s404_s0, 128, %s17_s10, [#allocation3]  }
  0x13   :  { %s284_s25 = scalar_lea.hbm %s405_s1, 4096 }
  0x14   :  { %p285_p8 = scmp.ne.s32.totalorder %s405_s1, %s284_s25  ;;  %p288_p9 = scmp.lt.u32.totalorder %s284_s25, %s405_s1 }
  0x16   :  { %p290_p10 = pnand %p288_p9, %p285_p8 }
  0x18   :  { %293 = shalt.err (!%p290_p10)
}
  0x19   :  { %s294_s30 = scalar_lea.vmem %s357_s12, 4096  ;;  %p299_p12 = scmp.lt.s32.totalorder %s357_s12, %s357_s12 }
  0x1a   :  { %p295_p11 = scmp.ne.s32.totalorder %s357_s12, %s294_s30  ;;  %p300_p13 = scmp.lt.s32.totalorder %s294_s30, %s294_s30 }
  0x1c   :  { %p301_p0 = por %p300_p13, %p299_p12 }
  0x1e   :  { %p302_p1 = pnand %p301_p0, %p295_p11 }
  0x20   :  { %305 = shalt.err (!%p302_p1)
}
  0x21   :  { %s336_s0 = smov 256   ;;  %s337_s3 = smov 16  }
  0x22   :  { %31 = dma.hbm_to_vmem [thread:$0]  %s405_s1, 4096, %s357_s12, [#allocation6], %s336_s0, %s336_s0, %s337_s3  }
  0x23   :  { %328 = dma.done.wait [#allocation3], 128  }
  0x24   :  { %329 = vsyncadd [#allocation3], 4294967168 }
  0x25   :  { %330 = dma.done.wait [#allocation6], 4096  }
  0x26   :  { %331 = vsyncadd [#allocation6], 4294963200  ;;  %v338_v0 = vmov 0.0   ;;  %v48_v1 = vld [vmem:[#allocation5 + $0x8] sm:$0xff]  ;;  %v50_v2 = vld [vmem:[#allocation5 + $0x18] sm:$0xff]  ;;  %s339_s1 = smov [#allocation7]  }
  0x27   :  { %143 = vmatprep.mubr.f32.mxu0 %v338_v0  ;;  %155 = vmatprep.mubr.f32.mxu1 %v338_v0  ;;  %v47_v3 = vld [vmem:[#allocation5] sm:$0xff]  ;;  %v198_v4 = vpack.c.bf16 %v50_v2, %v48_v1  ;;  %v49_v5 = vld [vmem:[#allocation5 + $0x10] sm:$0xff]  ;;  %v52_v6 = vld [vmem:[#allocation5 + $0x28] sm:$0xff]  ;;  %s185_s6 = sshll.u32 %s339_s1, 4  ;;  %s186_s6 = int_to_ptr.vmem [resolvable:$true] %s185_s6 }
  0x28   :  { %v54_v7 = vld [vmem:[#allocation5 + $0x38] sm:$0xff]  ;;  %v200_v8 = vpack.c.bf16 %v49_v5, %v47_v3  ;;  %v51_v10 = vld [vmem:[#allocation5 + $0x20] sm:$0xff]  ;;  %v53_v11 = vld [vmem:[#allocation5 + $0x30] sm:$0xff]  ;;  %s306_s7 = scalar_lea.vmem %s186_s6, 512  ;;  %p311_p3 = scmp.lt.s32.totalorder %s186_s6, %s186_s6 }
  0x29   :  { %v202_v9 = vpack.c.bf16 %v54_v7, %v52_v6  ;;  %v56_v12 = vld [vmem:[#allocation5 + $0x48] sm:$0xff]  ;;  %199 = vmatprep.subr.bf16.mxu0 %v198_v4  ;;  %230 = vmatprep.subr.bf16.mxu1 %v198_v4  ;;  %v58_v13 = vld [vmem:[#allocation5 + $0x58] sm:$0xff]  ;;  %v204_v14 = vpack.c.bf16 %v53_v11, %v51_v10  ;;  %v55_v16 = vld [vmem:[#allocation5 + $0x40] sm:$0xff]  ;;  %p307_p2 = scmp.ne.s32.totalorder %s186_s6, %s306_s7  ;;  %p312_p4 = scmp.lt.s32.totalorder %s306_s7, %s306_s7 }
  0x2a   :  { %201 = vmatpush1.bf16.msra.mxu0 %v200_v8  ;;  %238 = vmatpush1.bf16.msra.mxu1 %v200_v8  ;;  %v206_v15 = vpack.c.bf16 %v58_v13, %v56_v12  ;;  %v57_v17 = vld [vmem:[#allocation5 + $0x50] sm:$0xff]  ;;  %v60_v18 = vld [vmem:[#allocation5 + $0x68] sm:$0xff]  ;;  %v62_v19 = vld [vmem:[#allocation5 + $0x78] sm:$0xff] }
  0x2b   :  { %203 = vmatprep.subr.bf16.mxu0 %v202_v9  ;;  %231 = vmatprep.subr.bf16.mxu1 %v202_v9  ;;  %v208_v20 = vpack.c.bf16 %v57_v17, %v55_v16  ;;  %v210_v21 = vpack.c.bf16 %v62_v19, %v60_v18  ;;  %v59_v22 = vld [vmem:[#allocation5 + $0x60] sm:$0xff]  ;;  %v61_v23 = vld [vmem:[#allocation5 + $0x70] sm:$0xff]  ;;  %v64_v24 = vld [vmem:[#allocation5 + $0x88] sm:$0xff]  ;;  %p313_p5 = por %p312_p4, %p311_p3 }
  0x2c   :  { %v66_v25 = vld [vmem:[#allocation5 + $0x98] sm:$0xff]  ;;  %v212_v26 = vpack.c.bf16 %v61_v23, %v59_v22  ;;  %v63_v28 = vld [vmem:[#allocation5 + $0x80] sm:$0xff]  ;;  %v65_v29 = vld [vmem:[#allocation5 + $0x90] sm:$0xff] }
  0x2d   :  { %v214_v27 = vpack.c.bf16 %v66_v25, %v64_v24  ;;  %v68_v30 = vld [vmem:[#allocation5 + $0xa8] sm:$0xff]  ;;  %v70_v31 = vld [vmem:[#allocation5 + $0xb8] sm:$0xff]  ;;  %v216_v32 = vpack.c.bf16 %v65_v29, %v63_v28  ;;  %v67_v34 = vld [vmem:[#allocation5 + $0xa0] sm:$0xff]  ;;  %p314_p6 = pnand %p313_p5, %p307_p2 }
  0x2e   :  { %205 = vmatpush1.bf16.msra.mxu0 %v204_v14  ;;  %239 = vmatpush1.bf16.msra.mxu1 %v204_v14  ;;  %v218_v33 = vpack.c.bf16 %v70_v31, %v68_v30  ;;  %v69_v35 = vld [vmem:[#allocation5 + $0xb0] sm:$0xff]  ;;  %v72_v36 = vld [vmem:[#allocation5 + $0xc8] sm:$0xff]  ;;  %v74_v37 = vld [vmem:[#allocation5 + $0xd8] sm:$0xff] }
  0x2f   :  { %207 = vmatprep.subr.bf16.mxu0 %v206_v15  ;;  %232 = vmatprep.subr.bf16.mxu1 %v206_v15  ;;  %v220_v38 = vpack.c.bf16 %v69_v35, %v67_v34  ;;  %v222_v39 = vpack.c.bf16 %v74_v37, %v72_v36  ;;  %v71_v40 = vld [vmem:[#allocation5 + $0xc0] sm:$0xff]  ;;  %v73_v41 = vld [vmem:[#allocation5 + $0xd0] sm:$0xff]  ;;  %v76_v42 = vld [vmem:[#allocation5 + $0xe8] sm:$0xff] }
  0x30   :  { %v78_v43 = vld [vmem:[#allocation5 + $0xf8] sm:$0xff]  ;;  %v224_v44 = vpack.c.bf16 %v73_v41, %v71_v40  ;;  %v75_v47 = vld [vmem:[#allocation5 + $0xe0] sm:$0xff]  ;;  %v77_v48 = vld [vmem:[#allocation5 + $0xf0] sm:$0xff] }
  0x31   :  { %v38_v45 = vld [vmem:[#allocation2] sm:$0xff]  ;;  %v226_v46 = vpack.c.bf16 %v78_v43, %v76_v42  ;;  %v228_v51 = vpack.c.bf16 %v77_v48, %v75_v47 }
  0x32   :  { %209 = vmatpush1.bf16.msra.mxu0 %v208_v20  ;;  %240 = vmatpush1.bf16.msra.mxu1 %v208_v20  ;;  %v39_v49 = vunpack.c.0.s8 %v38_v45  ;;  %v41_v50 = vunpack.c.2.s8 %v38_v45  ;;  %v40_v54 = vunpack.c.1.s8 %v38_v45  ;;  %v42_v55 = vunpack.c.3.s8 %v38_v45 }
  0x33   :  { %211 = vmatprep.subr.bf16.mxu0 %v210_v21  ;;  %233 = vmatprep.subr.bf16.mxu1 %v210_v21 }
  0x34   :  { %v43_v52 = vcvt.s32.f32 %v39_v49  ;;  %v45_v53 = vcvt.s32.f32 %v41_v50  ;;  %v44_v56 = vcvt.s32.f32 %v40_v54  ;;  %v46_v57 = vcvt.s32.f32 %v42_v55 }
  0x36   :  { %213 = vmatpush1.bf16.msra.mxu0 %v212_v26  ;;  %241 = vmatpush1.bf16.msra.mxu1 %v212_v26 }
  0x37   :  { %215 = vmatprep.subr.bf16.mxu0 %v214_v27  ;;  %234 = vmatprep.subr.bf16.mxu1 %v214_v27 }
  0x3a   :  { %217 = vmatpush1.bf16.msra.mxu0 %v216_v32  ;;  %242 = vmatpush1.bf16.msra.mxu1 %v216_v32 }
  0x3b   :  { %219 = vmatprep.subr.bf16.mxu0 %v218_v33  ;;  %235 = vmatprep.subr.bf16.mxu1 %v218_v33 }
  0x3e   :  { %221 = vmatpush1.bf16.msra.mxu0 %v220_v38  ;;  %243 = vmatpush1.bf16.msra.mxu1 %v220_v38 }
  0x3f   :  { %223 = vmatprep.subr.bf16.mxu0 %v222_v39  ;;  %236 = vmatprep.subr.bf16.mxu1 %v222_v39 }
  0x42   :  { %225 = vmatpush1.bf16.msra.mxu0 %v224_v44  ;;  %244 = vmatpush1.bf16.msra.mxu1 %v224_v44 }
  0x43   :  { %227 = vmatprep.subr.bf16.mxu0 %v226_v46  ;;  %237 = vmatprep.subr.bf16.mxu1 %v226_v46 }
  0x46   :  { %229 = vmatpush1.bf16.msra.mxu0 %v228_v51  ;;  %245 = vmatpush1.bf16.msra.mxu1 %v228_v51 }
  0x49   :  { %144 = vmatmul.mubr.f32.vlgmr.msra.gmra.mrb[0].mxu0 %v43_v52  ;;  %156 = vmatmul.mubr.f32.vlgmr.msra.gmra.mrb[0].mxu1 %v45_v53 }
  0x4a   :  { %149 = vmatprep.mubr.f32.mxu0 %v338_v0  ;;  %161 = vmatprep.mubr.f32.mxu1 %v338_v0 }
  0x4d   :  { %150 = vmatmul.mubr.f32.gmra.mrb[2].mxu0 %v44_v56  ;;  %162 = vmatmul.mubr.f32.gmra.mrb[2].mxu1 %v46_v57 }
 0x11c   :  { %v145_v58 = vpop.f32.mrb[0].mxu0  ;;  %v157_v59 = vpop.f32.mrb[0].mxu1 }
 0x11d   :  { %v147_v60 = vpop.f32.mrb[1].mxu0  ;;  %v159_v61 = vpop.f32.mrb[1].mxu1 }
 0x11e   :  { %254 = vrcp.f32 %v147_v60 }
 0x11f   :  { %256 = vrcp.f32 %v159_v61 }
 0x120   :  { %v151_v62 = vpop.f32.mrb[2].mxu0  ;;  %v163_v63 = vpop.f32.mrb[2].mxu1 }
 0x121   :  { %v153_v1 = vpop.f32.mrb[3].mxu0  ;;  %v165_v2 = vpop.f32.mrb[3].mxu1 }
 0x122   :  { %258 = vrcp.f32 %v153_v1 }
 0x123   :  { %260 = vrcp.f32 %v165_v2 }
 0x128   :  { %v255_v3 = vpop.eup %254 }
 0x129   :  { %v257_v4 = vpop.eup %256  ;;  %v169_v5 = vmul.f32 %v255_v3, %v145_v58 }
 0x12a   :  { %v173_v6 = vmul.f32 %v257_v4, %v157_v59 }
 0x12b   :  { %176 = vst [vmem:[#allocation7] sm:$0xff] %v169_v5 }
 0x12c   :  { %v259_v0 = vpop.eup %258  ;;  %178 = vst [vmem:[#allocation7 + $0x10] sm:$0xff] %v173_v6 }
 0x12d   :  { %v261_v7 = vpop.eup %260  ;;  %v171_v8 = vmul.f32 %v259_v0, %v151_v62 }
 0x12e   :  { %v175_v9 = vmul.f32 %v261_v7, %v163_v63 }
 0x12f   :  { %177 = vst [vmem:[#allocation7 + $0x8] sm:$0xff] %v171_v8 }
 0x130   :  { %179 = vst [vmem:[#allocation7 + $0x18] sm:$0xff] %v175_v9 }
 0x131   :  { %317 = shalt.err (!%p314_p6)
}
 0x132   :  { %s318_s10 = scalar_lea.hbm %s406_s2, 512 }
 0x133   :  { %p319_p7 = scmp.ne.s32.totalorder %s406_s2, %s318_s10  ;;  %p322_p8 = scmp.lt.u32.totalorder %s318_s10, %s406_s2 }
 0x135   :  { %p324_p9 = pnand %p322_p8, %p319_p7 }
 0x137   :  { %327 = shalt.err (!%p324_p9)
}
 0x138   :  { %s340_s15 = smov 128   ;;  %s341_s16 = smov 8  }
 0x139   :  { %191 = dma.vmem_to_hbm [thread:$0]  %s186_s6, 512, %s406_s2, [#allocation4], %s340_s15, %s340_s15, %s341_s16  }
 0x13a   :  { %332 = dma.done.wait [#allocation4], 512  }
 0x13b   :  { %333 = vsyncadd [#allocation4], 4294966784 }
 0x13c   :  { %195 = vsyncpa [#allocation3], 1 }
 0x13d   :  { %196 = vsyncpa [#allocation6], 1 }
 0x13e   :  { %197 = vsyncpa [#allocation4], 1 }

</bundles_post_ra>
